<compile_context>
chip_gen: v6e
topology: v6e:2x2x1
jax: 0.10.0
libtpu: 0.0.40
codegen_flags: <defaults>
</compile_context>

<pallas_src>
import functools
import math

import jax
import jax.numpy as jnp
from jax.experimental import pallas as pl
from jax.experimental.pallas import tpu as pltpu

LANE = 128
MAX_TILE_S = 1024      # sublanes per tile; 1024 * 128 lanes * 3 ch * 4 B = 1.5 MiB/block
N_CORE_SPLIT = 2       # second parallel axis for v7x dual TensorCores


def _cdiv(a, b):
    return -(-a // b)


def _round_up(x, m):
    return ((x + m - 1) // m) * m


def _loss_tiling(s):
    """Pick (tile_s, tiles_per_core, s_padded) for the loss reduction.

    tile_s is a multiple of 8 (sublane rule), capped at MAX_TILE_S so the
    loss kernel's 3 double-buffered input streams stay inside the 16 MiB
    default scoped VMEM of v5e.  S is padded so it splits exactly into
    N_CORE_SPLIT contiguous ranges of `tiles_per_core` tiles."""
    tile_s = min(MAX_TILE_S, _round_up(_cdiv(s, N_CORE_SPLIT), 8))
    tiles_per_core = _cdiv(s, N_CORE_SPLIT * tile_s)
    s_pad = N_CORE_SPLIT * tiles_per_core * tile_s
    return tile_s, tiles_per_core, s_pad


# ----------------------------------------------------------------------------
# Kernel 1: rigid transform + mask (Pose.apply_transformation * mask_vm)
# ----------------------------------------------------------------------------
def _transform_kernel(pose_ref, pts_ref, out_ref):
    """pose_ref: (B, 4, 4) f32 in SMEM (whole array, scalar reads)
       pts_ref : (1, 3, TILE_S, 128) f32 in VMEM
       out_ref : (1, 3, TILE_S, 128) f32 in VMEM"""
    b = pl.program_id(0)
    x = pts_ref[0, 0]                               # (TILE_S, 128)
    y = pts_ref[0, 1]
    z = pts_ref[0, 2]
    # mask_vm = (||p|| != 0), computed on the UNtransformed points
    mask = ((x * x + y * y + z * z) != 0.0).astype(jnp.float32)
    for r in range(3):                              # static 3-row unroll
        row = (pose_ref[b, r, 0] * x + pose_ref[b, r, 1] * y
               + pose_ref[b, r, 2] * z + pose_ref[b, r, 3])
        out_ref[0, r] = row * mask                  # full-vreg unmasked stores


def transform_points(pts, pose, tile_s):
    """pts: (B, 3, S_pad, 128) f32, pose: (B, 4, 4) f32 -> same shape f32."""
    b, _, s, lane = pts.shape
    blk = pl.BlockSpec((1, 3, tile_s, lane), lambda i, j: (i, 0, j, 0))
    return pl.pallas_call(
        _transform_kernel,
        out_shape=jax.ShapeDtypeStruct(pts.shape, jnp.float32),
        grid_spec=pltpu.PrefetchScalarGridSpec(
            num_scalar_prefetch=0,
            grid=(b, s // tile_s),
            in_specs=[
                pl.BlockSpec(memory_space=pltpu.MemorySpace.SMEM),   # pose
                blk,                                                  # points
            ],
            out_specs=blk,
        ),
        input_output_aliases={1: 0},                 # write in place of dead input
        compiler_params=pltpu.CompilerParams(
            dimension_semantics=("parallel", "parallel")),
    )(pose, pts)


# ----------------------------------------------------------------------------
# Kernel 2: point-to-plane residual + Geman-McClure cost^2 + per-batch sums
# ----------------------------------------------------------------------------
def _loss_kernel(pt_ref, pr_ref, nr_ref, cost_out_ref, mask_out_ref,
                 acc_cost, acc_mask, *, sigma):
    """pt/pr/nr_ref : (1, 3, TILE_S, 128) f32 inputs
       cost/mask_out: (1, 1, 8, 128) f32 per-(batch, core) partial sums
       acc_cost/mask: (8, 128) f32 VMEM scratch accumulators (full vregs)."""
    j = pl.program_id(2)

    @pl.when(j == 0)
    def _():
        acc_cost[...] = jnp.zeros_like(acc_cost)
        acc_mask[...] = jnp.zeros_like(acc_mask)

    ptx, pty, ptz = pt_ref[0, 0], pt_ref[0, 1], pt_ref[0, 2]
    prx, pry, prz = pr_ref[0, 0], pr_ref[0, 1], pr_ref[0, 2]
    nrx, nry, nrz = nr_ref[0, 0], nr_ref[0, 1], nr_ref[0, 2]

    mask = (((nrx * nrx + nry * nry + nrz * nrz) != 0.0)
            & ((prx * prx + pry * pry + prz * prz) != 0.0)
            & ((ptx * ptx + pty * pty + ptz * ptz) != 0.0)).astype(jnp.float32)

    dotp = ((prx - ptx) * nrx + (pry - pty) * nry + (prz - ptz) * nrz)
    # residual^2 = (mask * |dotp|)^2 = mask * dotp^2   (mask is 0/1 -> no abs)
    r2 = mask * dotp * dotp
    s2 = sigma * sigma
    denom = s2 + r2
    wgt = s2 / (denom * denom)            # Geman-McClure IRLS weight
    cost_sq = (wgt + 1e-10) * r2          # == (sqrt(wgt+eps) * residual)^2

    # Fold the TILE_S sublane axis onto 8 sublanes (layout-preserving reshape),
    # accumulate as full unmasked vreg adds; final lane/sublane reduce in JAX.
    ts = cost_sq.shape[0]
    acc_cost[...] += jnp.sum(cost_sq.reshape(ts // 8, 8, LANE), axis=0)
    acc_mask[...] += jnp.sum(mask.reshape(ts // 8, 8, LANE), axis=0)

    @pl.when(j == pl.num_programs(2) - 1)
    def _():
        cost_out_ref[0, 0] = acc_cost[...]
        mask_out_ref[0, 0] = acc_mask[...]


def loss_reduce(pc_transformed, pc_reference, nm_reference, sigma,
                tile_s, tiles_per_core):
    """inputs: (B, 3, S_pad, 128) f32 -> (cost_sq_sum, mask_sum) each (B,)."""
    b, _, s, lane = pc_transformed.shape
    t = tiles_per_core
    assert s == N_CORE_SPLIT * t * tile_s and tile_s % 8 == 0

    in_blk = pl.BlockSpec((1, 3, tile_s, lane),
                          lambda i, c, j: (i, 0, c * t + j, 0))
    out_blk = pl.BlockSpec((1, 1, 8, lane), lambda i, c, j: (i, c, 0, 0))
    out_sds = jax.ShapeDtypeStruct((b, N_CORE_SPLIT, 8, lane), jnp.float32)

    cost_part, mask_part = pl.pallas_call(
        functools.partial(_loss_kernel, sigma=sigma),
        out_shape=(out_sds, out_sds),
        grid_spec=pltpu.PrefetchScalarGridSpec(
            num_scalar_prefetch=0,
            grid=(b, N_CORE_SPLIT, t),
            in_specs=[in_blk, in_blk, in_blk],
            out_specs=(out_blk, out_blk),
            scratch_shapes=[pltpu.VMEM((8, lane), jnp.float32),
                            pltpu.VMEM((8, lane), jnp.float32)],
        ),
        compiler_params=pltpu.CompilerParams(
            dimension_semantics=("parallel", "parallel", "arbitrary")),
    )(pc_transformed, pc_reference, nm_reference)

    cost_sq_sum = jnp.sum(cost_part, axis=(1, 2, 3))
    mask_sum = jnp.sum(mask_part, axis=(1, 2, 3))
    return cost_sq_sum, mask_sum


# ----------------------------------------------------------------------------
# Glue: synthetic spherical projector (Projector.build_projection_map)
# ----------------------------------------------------------------------------
def spherical_projection_map(pc, h, w, fov_up_deg=25.0, fov_down_deg=-25.0):
    """pc: (B, 3, N) -> projected vertex map flattened back to (B, 3, H*W)."""
    # TODO(synk): data-dependent pixel scatter has no clean Pallas TPU
    # equivalent; done with jnp scatter (last-writer-wins on collisions).
    b, _, n = pc.shape
    x, y, z = pc[:, 0], pc[:, 1], pc[:, 2]
    r = jnp.sqrt(x * x + y * y + z * z)
    valid = r > 0.0
    theta = jnp.arctan2(y, x)
    phi = jnp.arcsin(jnp.clip(z / jnp.where(valid, r, 1.0), -1.0, 1.0))
    fov_up = math.radians(fov_up_deg)
    fov_down = math.radians(fov_down_deg)
    col = jnp.floor(0.5 * (theta / jnp.pi + 1.0) * w)
    row = jnp.floor((1.0 - (phi - fov_down) / (fov_up - fov_down)) * h)
    col = jnp.clip(col, 0, w - 1).astype(jnp.int32)
    row = jnp.clip(row, 0, h - 1).astype(jnp.int32)
    flat = row * w + col
    flat = jnp.where(valid, flat, h * w)          # dump invalid points in extra slot

    pts = jnp.transpose(pc, (0, 2, 1))            # (B, N, 3)
    vm = jnp.zeros((b, h * w + 1, 3), pc.dtype)
    batch_idx = jnp.arange(b)[:, None]
    vm = vm.at[batch_idx, flat].set(pts)
    vm = vm[:, : h * w, :]                        # (B, H*W, 3)
    return jnp.transpose(vm, (0, 2, 1))           # (B, 3, H*W)


# ----------------------------------------------------------------------------
# Forward pass of _PointToPlaneLossModule
# ----------------------------------------------------------------------------
@functools.partial(jax.jit, static_argnames=("sigma",))
def point_to_plane_forward(vertex_map, normal_map, pose_params, sigma=0.5):
    # TODO(synk): compute_normal_map fallback (normal_map absent) and
    # Pose.build_pose_matrix (pose_params not 4x4) paths not implemented;
    # normal_map and a (B,4,4) pose matrix are supplied directly.
    b, s, c, h, w = vertex_map.shape
    assert s == 2 and c == 3
    n = h * w
    s_raw = _cdiv(n, LANE)
    tile_s, tiles_per_core, s_pad = _loss_tiling(s_raw)
    n_pad = s_pad * LANE

    def to_planes(img):
        """(B, 3, H, W) -> channel-planar, lane-dense (B, 3, S_pad, 128),
        zero-padded (padded points have zero norm -> masked out)."""
        flat = img.reshape(b, 3, n)
        if n_pad != n:
            flat = jnp.pad(flat, ((0, 0), (0, 0), (0, n_pad - n)))
        return flat.reshape(b, 3, s_pad, LANE)

    tgt_vmap = to_planes(vertex_map[:, 1])        # target points
    ref_vmap = to_planes(vertex_map[:, 0])        # reference points
    ref_nmap = to_planes(normal_map[:, 0])        # reference normals

    # 1) rigid transform + zero mask          (Pallas kernel, pose via SMEM)
    pc_transformed_target = transform_points(tgt_vmap, pose_params, tile_s)
    # 2) re-project transformed target into the image grid   (JAX glue scatter)
    vm_transformed = spherical_projection_map(
        pc_transformed_target.reshape(b, 3, n_pad), h, w)       # (B, 3, H*W)
    if n_pad != n:
        vm_transformed = jnp.pad(vm_transformed, ((0, 0), (0, 0), (0, n_pad - n)))
    pc_transformed = vm_transformed.reshape(b, 3, s_pad, LANE)
    # 3) residuals + robust cost + per-batch reductions       (Pallas kernel)
    cost_sq_sum, mask_sum = loss_reduce(pc_transformed, ref_vmap, ref_nmap,
                                        sigma, tile_s, tiles_per_core)

    # ((cost^2).sum / mask.sum).mean(), guarded against empty batches (0/0)
    per_batch = jnp.where(mask_sum > 0.0,
                          cost_sq_sum / jnp.maximum(mask_sum, 1.0),
                          0.0)
    loss_icp = jnp.mean(per_batch)
    return loss_icp                               # outer .mean() over a scalar is a no-op


# ----------------------------------------------------------------------------
if __name__ == "__main__":
    key = jax.random.PRNGKey(0)
    k1, k2 = jax.random.split(key)

    B, S, C, H, W = 2, 2, 3, 16, 16

    # vertex map: random 3D points; zero-out a small patch to exercise the mask
    vertex_map = 2.0 * jax.random.normal(k1, (B, S, C, H, W), dtype=jnp.float32)
    vertex_map = vertex_map.at[:, :, :, :2, :2].set(0.0)

    # normal map: random unit normals
    normal_map = jax.random.normal(k2, (B, S, C, H, W), dtype=jnp.float32)
    normal_map = normal_map / (
        jnp.linalg.norm(normal_map, axis=2, keepdims=True) + 1e-8)

    # relative pose as a 4x4 matrix (so build_pose_matrix is skipped)
    def pose_matrix(angle, tx, ty, tz):
        cth, sth = math.cos(angle), math.sin(angle)
        return jnp.array(
            [[cth, -sth, 0.0, tx],
             [sth,  cth, 0.0, ty],
             [0.0,  0.0, 1.0, tz],
             [0.0,  0.0, 0.0, 1.0]], dtype=jnp.float32)

    pose_params = jnp.stack([
        pose_matrix(0.05, 0.10, -0.05, 0.02),
        pose_matrix(-0.03, -0.02, 0.04, 0.01),
    ])

    loss = point_to_plane_forward(vertex_map, normal_map, pose_params, sigma=0.5)
    loss = jax.block_until_ready(loss)
    assert loss.shape == () and jnp.isfinite(loss)
    print("KERNEL_OK")
</pallas_src>

<mosaic_0001>
module attributes {stable_mosaic.version = 11 : i64} {
  func.func @_transform_kernel(%arg0: i32, %arg1: i32, %arg2: memref<2x4x4xf32, #tpu.memory_space<smem>>, %arg3: memref<1x3x8x128xf32, #tpu.memory_space<vmem>>, %arg4: memref<1x3x8x128xf32, #tpu.memory_space<vmem>>) attributes {dimension_semantics = [#tpu.dimension_semantics<parallel>, #tpu.dimension_semantics<parallel>], iteration_bounds = array<i64: 2, 2>, scalar_prefetch = 0 : i64, scratch_operands = 0 : i64, tpu.core_type = #tpu.core_type<tc>, window_params = [{transform_indices = @transform_0, window_bounds = array<i64: 2, 4, 4>}, {transform_indices = @transform_1, window_bounds = array<i64: 1, 3, 8, 128>}, {transform_indices = @transform_2, window_bounds = array<i64: 1, 3, 8, 128>}]} {
    %c0 = arith.constant 0 : index
    %c0_0 = arith.constant 0 : index
    %c0_1 = arith.constant 0 : index
    %c0_2 = arith.constant 0 : index
    %0 = vector.load %arg3[%c0, %c0_0, %c0_1, %c0_2] : memref<1x3x8x128xf32, #tpu.memory_space<vmem>>, vector<1x1x8x128xf32>
    %1 = vector.shape_cast %0 : vector<1x1x8x128xf32> to vector<8x128xf32>
    %c0_3 = arith.constant 0 : index
    %c1 = arith.constant 1 : index
    %c0_4 = arith.constant 0 : index
    %c0_5 = arith.constant 0 : index
    %2 = vector.load %arg3[%c0_3, %c1, %c0_4, %c0_5] : memref<1x3x8x128xf32, #tpu.memory_space<vmem>>, vector<1x1x8x128xf32>
    %3 = vector.shape_cast %2 : vector<1x1x8x128xf32> to vector<8x128xf32>
    %c0_6 = arith.constant 0 : index
    %c2 = arith.constant 2 : index
    %c0_7 = arith.constant 0 : index
    %c0_8 = arith.constant 0 : index
    %4 = vector.load %arg3[%c0_6, %c2, %c0_7, %c0_8] : memref<1x3x8x128xf32, #tpu.memory_space<vmem>>, vector<1x1x8x128xf32>
    %5 = vector.shape_cast %4 : vector<1x1x8x128xf32> to vector<8x128xf32>
    %6 = arith.mulf %1, %1 : vector<8x128xf32>
    %7 = arith.mulf %3, %3 : vector<8x128xf32>
    %8 = arith.addf %6, %7 : vector<8x128xf32>
    %9 = arith.mulf %5, %5 : vector<8x128xf32>
    %10 = arith.addf %8, %9 : vector<8x128xf32>
    %cst = arith.constant 0.000000e+00 : f32
    %11 = vector.broadcast %cst : f32 to vector<8x128xf32>
    %12 = arith.cmpf one, %10, %11 : vector<8x128xf32>
    %13 = arith.extui %12 : vector<8x128xi1> to vector<8x128xi32>
    %14 = arith.sitofp %13 : vector<8x128xi32> to vector<8x128xf32>
    %15 = arith.index_cast %arg0 : i32 to index
    %c0_9 = arith.constant 0 : index
    %c0_10 = arith.constant 0 : index
    %16 = memref.load %arg2[%15, %c0_9, %c0_10] : memref<2x4x4xf32, #tpu.memory_space<smem>>
    %17 = vector.broadcast %16 : f32 to vector<8x128xf32>
    %18 = arith.mulf %17, %1 : vector<8x128xf32>
    %19 = arith.index_cast %arg0 : i32 to index
    %c0_11 = arith.constant 0 : index
    %c1_12 = arith.constant 1 : index
    %20 = memref.load %arg2[%19, %c0_11, %c1_12] : memref<2x4x4xf32, #tpu.memory_space<smem>>
    %21 = vector.broadcast %20 : f32 to vector<8x128xf32>
    %22 = arith.mulf %21, %3 : vector<8x128xf32>
    %23 = arith.addf %18, %22 : vector<8x128xf32>
    %24 = arith.index_cast %arg0 : i32 to index
    %c0_13 = arith.constant 0 : index
    %c2_14 = arith.constant 2 : index
    %25 = memref.load %arg2[%24, %c0_13, %c2_14] : memref<2x4x4xf32, #tpu.memory_space<smem>>
    %26 = vector.broadcast %25 : f32 to vector<8x128xf32>
    %27 = arith.mulf %26, %5 : vector<8x128xf32>
    %28 = arith.addf %23, %27 : vector<8x128xf32>
    %29 = arith.index_cast %arg0 : i32 to index
    %c0_15 = arith.constant 0 : index
    %c3 = arith.constant 3 : index
    %30 = memref.load %arg2[%29, %c0_15, %c3] : memref<2x4x4xf32, #tpu.memory_space<smem>>
    %31 = vector.broadcast %30 : f32 to vector<8x128xf32>
    %32 = arith.addf %28, %31 : vector<8x128xf32>
    %33 = arith.mulf %32, %14 : vector<8x128xf32>
    %c0_16 = arith.constant 0 : index
    %c0_17 = arith.constant 0 : index
    %c0_18 = arith.constant 0 : index
    %c0_19 = arith.constant 0 : index
    %34 = vector.load %arg4[%c0_16, %c0_17, %c0_18, %c0_19] : memref<1x3x8x128xf32, #tpu.memory_space<vmem>>, vector<1x1x8x128xf32>
    %35 = vector.shape_cast %34 : vector<1x1x8x128xf32> to vector<8x128xf32>
    %36 = vector.shape_cast %33 : vector<8x128xf32> to vector<1x1x8x128xf32>
    tpu.vector_store %arg4[%c0_16, %c0_17, %c0_18, %c0_19], %36 {strides = array<i32>} : memref<1x3x8x128xf32, #tpu.memory_space<vmem>>, vector<1x1x8x128xf32>,
    %37 = arith.index_cast %arg0 : i32 to index
    %c1_20 = arith.constant 1 : index
    %c0_21 = arith.constant 0 : index
    %38 = memref.load %arg2[%37, %c1_20, %c0_21] : memref<2x4x4xf32, #tpu.memory_space<smem>>
    %39 = vector.broadcast %38 : f32 to vector<8x128xf32>
    %40 = arith.mulf %39, %1 : vector<8x128xf32>
    %41 = arith.index_cast %arg0 : i32 to index
    %c1_22 = arith.constant 1 : index
    %c1_23 = arith.constant 1 : index
    %42 = memref.load %arg2[%41, %c1_22, %c1_23] : memref<2x4x4xf32, #tpu.memory_space<smem>>
    %43 = vector.broadcast %42 : f32 to vector<8x128xf32>
    %44 = arith.mulf %43, %3 : vector<8x128xf32>
    %45 = arith.addf %40, %44 : vector<8x128xf32>
    %46 = arith.index_cast %arg0 : i32 to index
    %c1_24 = arith.constant 1 : index
    %c2_25 = arith.constant 2 : index
    %47 = memref.load %arg2[%46, %c1_24, %c2_25] : memref<2x4x4xf32, #tpu.memory_space<smem>>
    %48 = vector.broadcast %47 : f32 to vector<8x128xf32>
    %49 = arith.mulf %48, %5 : vector<8x128xf32>
    %50 = arith.addf %45, %49 : vector<8x128xf32>
    %51 = arith.index_cast %arg0 : i32 to index
    %c1_26 = arith.constant 1 : index
    %c3_27 = arith.constant 3 : index
    %52 = memref.load %arg2[%51, %c1_26, %c3_27] : memref<2x4x4xf32, #tpu.memory_space<smem>>
    %53 = vector.broadcast %52 : f32 to vector<8x128xf32>
    %54 = arith.addf %50, %53 : vector<8x128xf32>
    %55 = arith.mulf %54, %14 : vector<8x128xf32>
    %c0_28 = arith.constant 0 : index
    %c1_29 = arith.constant 1 : index
    %c0_30 = arith.constant 0 : index
    %c0_31 = arith.constant 0 : index
    %56 = vector.load %arg4[%c0_28, %c1_29, %c0_30, %c0_31] : memref<1x3x8x128xf32, #tpu.memory_space<vmem>>, vector<1x1x8x128xf32>
    %57 = vector.shape_cast %56 : vector<1x1x8x128xf32> to vector<8x128xf32>
    %58 = vector.shape_cast %55 : vector<8x128xf32> to vector<1x1x8x128xf32>
    tpu.vector_store %arg4[%c0_28, %c1_29, %c0_30, %c0_31], %58 {strides = array<i32>} : memref<1x3x8x128xf32, #tpu.memory_space<vmem>>, vector<1x1x8x128xf32>,
    %59 = arith.index_cast %arg0 : i32 to index
    %c2_32 = arith.constant 2 : index
    %c0_33 = arith.constant 0 : index
    %60 = memref.load %arg2[%59, %c2_32, %c0_33] : memref<2x4x4xf32, #tpu.memory_space<smem>>
    %61 = vector.broadcast %60 : f32 to vector<8x128xf32>
    %62 = arith.mulf %61, %1 : vector<8x128xf32>
    %63 = arith.index_cast %arg0 : i32 to index
    %c2_34 = arith.constant 2 : index
    %c1_35 = arith.constant 1 : index
    %64 = memref.load %arg2[%63, %c2_34, %c1_35] : memref<2x4x4xf32, #tpu.memory_space<smem>>
    %65 = vector.broadcast %64 : f32 to vector<8x128xf32>
    %66 = arith.mulf %65, %3 : vector<8x128xf32>
    %67 = arith.addf %62, %66 : vector<8x128xf32>
    %68 = arith.index_cast %arg0 : i32 to index
    %c2_36 = arith.constant 2 : index
    %c2_37 = arith.constant 2 : index
    %69 = memref.load %arg2[%68, %c2_36, %c2_37] : memref<2x4x4xf32, #tpu.memory_space<smem>>
    %70 = vector.broadcast %69 : f32 to vector<8x128xf32>
    %71 = arith.mulf %70, %5 : vector<8x128xf32>
    %72 = arith.addf %67, %71 : vector<8x128xf32>
    %73 = arith.index_cast %arg0 : i32 to index
    %c2_38 = arith.constant 2 : index
    %c3_39 = arith.constant 3 : index
    %74 = memref.load %arg2[%73, %c2_38, %c3_39] : memref<2x4x4xf32, #tpu.memory_space<smem>>
    %75 = vector.broadcast %74 : f32 to vector<8x128xf32>
    %76 = arith.addf %72, %75 : vector<8x128xf32>
    %77 = arith.mulf %76, %14 : vector<8x128xf32>
    %c0_40 = arith.constant 0 : index
    %c2_41 = arith.constant 2 : index
    %c0_42 = arith.constant 0 : index
    %c0_43 = arith.constant 0 : index
    %78 = vector.load %arg4[%c0_40, %c2_41, %c0_42, %c0_43] : memref<1x3x8x128xf32, #tpu.memory_space<vmem>>, vector<1x1x8x128xf32>
    %79 = vector.shape_cast %78 : vector<1x1x8x128xf32> to vector<8x128xf32>
    %80 = vector.shape_cast %77 : vector<8x128xf32> to vector<1x1x8x128xf32>
    tpu.vector_store %arg4[%c0_40, %c2_41, %c0_42, %c0_43], %80 {strides = array<i32>} : memref<1x3x8x128xf32, #tpu.memory_space<vmem>>, vector<1x1x8x128xf32>,
    return
  }
  func.func @transform_0(%arg0: i32, %arg1: i32) -> (i32, i32, i32) {
    %c0_i32 = arith.constant 0 : i32
    %c0_i32_0 = arith.constant 0 : i32
    %c0_i32_1 = arith.constant 0 : i32
    %c0_i32_2 = arith.constant 0 : i32
    return %c0_i32, %c0_i32_0, %c0_i32_1 : i32, i32, i32
  }
  func.func @transform_1(%arg0: i32, %arg1: i32) -> (i32, i32, i32, i32) {
    %c0_i32 = arith.constant 0 : i32
    %c0_i32_0 = arith.constant 0 : i32
    %c0_i32_1 = arith.constant 0 : i32
    return %arg0, %c0_i32, %arg1, %c0_i32_0 : i32, i32, i32, i32
  }
  func.func @transform_2(%arg0: i32, %arg1: i32) -> (i32, i32, i32, i32) {
    %c0_i32 = arith.constant 0 : i32
    %c0_i32_0 = arith.constant 0 : i32
    %c0_i32_1 = arith.constant 0 : i32
    return %arg0, %c0_i32, %arg1, %c0_i32_0 : i32, i32, i32, i32
  }
}

module attributes {stable_mosaic.version = 11 : i64} {
  func.func @_loss_kernel(%arg0: i32, %arg1: i32, %arg2: i32, %arg3: memref<1x3x8x128xf32, #tpu.memory_space<vmem>>, %arg4: memref<1x3x8x128xf32, #tpu.memory_space<vmem>>, %arg5: memref<1x3x8x128xf32, #tpu.memory_space<vmem>>, %arg6: memref<1x1x8x128xf32, #tpu.memory_space<vmem>>, %arg7: memref<1x1x8x128xf32, #tpu.memory_space<vmem>>, %arg8: memref<8x128xf32, #tpu.memory_space<vmem>>, %arg9: memref<8x128xf32, #tpu.memory_space<vmem>>) attributes {dimension_semantics = [#tpu.dimension_semantics<parallel>, #tpu.dimension_semantics<parallel>, #tpu.dimension_semantics<arbitrary>], iteration_bounds = array<i64: 2, 2, 1>, scalar_prefetch = 0 : i64, scratch_operands = 2 : i64, tpu.core_type = #tpu.core_type<tc>, window_params = [{transform_indices = @transform_0, window_bounds = array<i64: 1, 3, 8, 128>}, {transform_indices = @transform_1, window_bounds = array<i64: 1, 3, 8, 128>}, {transform_indices = @transform_2, window_bounds = array<i64: 1, 3, 8, 128>}, {transform_indices = @transform_3, window_bounds = array<i64: 1, 1, 8, 128>}, {transform_indices = @transform_4, window_bounds = array<i64: 1, 1, 8, 128>}]} {
    %c0_i32 = arith.constant 0 : i32
    %0 = arith.cmpi eq, %arg2, %c0_i32 : i32
    %1 = arith.extui %0 : i1 to i32
    %c0_i32_0 = arith.constant 0 : i32
    %2 = arith.cmpi ne, %1, %c0_i32_0 : i32
    scf.if %2 {
      %cst_51 = arith.constant 0.000000e+00 : f32
      %77 = vector.broadcast %cst_51 : f32 to vector<8x128xf32>
      %c0_52 = arith.constant 0 : index
      %c0_53 = arith.constant 0 : index
      %78 = vector.load %arg8[%c0_52, %c0_53] : memref<8x128xf32, #tpu.memory_space<vmem>>, vector<8x128xf32>
      tpu.vector_store %arg8[%c0_52, %c0_53], %77 {strides = array<i32>} : memref<8x128xf32, #tpu.memory_space<vmem>>, vector<8x128xf32>,
      %cst_54 = arith.constant 0.000000e+00 : f32
      %79 = vector.broadcast %cst_54 : f32 to vector<8x128xf32>
      %c0_55 = arith.constant 0 : index
      %c0_56 = arith.constant 0 : index
      %80 = vector.load %arg9[%c0_55, %c0_56] : memref<8x128xf32, #tpu.memory_space<vmem>>, vector<8x128xf32>
      tpu.vector_store %arg9[%c0_55, %c0_56], %79 {strides = array<i32>} : memref<8x128xf32, #tpu.memory_space<vmem>>, vector<8x128xf32>,
    } else {
    }
    %c0 = arith.constant 0 : index
    %c0_1 = arith.constant 0 : index
    %c0_2 = arith.constant 0 : index
    %c0_3 = arith.constant 0 : index
    %3 = vector.load %arg3[%c0, %c0_1, %c0_2, %c0_3] : memref<1x3x8x128xf32, #tpu.memory_space<vmem>>, vector<1x1x8x128xf32>
    %4 = vector.shape_cast %3 : vector<1x1x8x128xf32> to vector<8x128xf32>
    %c0_4 = arith.constant 0 : index
    %c1 = arith.constant 1 : index
    %c0_5 = arith.constant 0 : index
    %c0_6 = arith.constant 0 : index
    %5 = vector.load %arg3[%c0_4, %c1, %c0_5, %c0_6] : memref<1x3x8x128xf32, #tpu.memory_space<vmem>>, vector<1x1x8x128xf32>
    %6 = vector.shape_cast %5 : vector<1x1x8x128xf32> to vector<8x128xf32>
    %c0_7 = arith.constant 0 : index
    %c2 = arith.constant 2 : index
    %c0_8 = arith.constant 0 : index
    %c0_9 = arith.constant 0 : index
    %7 = vector.load %arg3[%c0_7, %c2, %c0_8, %c0_9] : memref<1x3x8x128xf32, #tpu.memory_space<vmem>>, vector<1x1x8x128xf32>
    %8 = vector.shape_cast %7 : vector<1x1x8x128xf32> to vector<8x128xf32>
    %c0_10 = arith.constant 0 : index
    %c0_11 = arith.constant 0 : index
    %c0_12 = arith.constant 0 : index
    %c0_13 = arith.constant 0 : index
    %9 = vector.load %arg4[%c0_10, %c0_11, %c0_12, %c0_13] : memref<1x3x8x128xf32, #tpu.memory_space<vmem>>, vector<1x1x8x128xf32>
    %10 = vector.shape_cast %9 : vector<1x1x8x128xf32> to vector<8x128xf32>
    %c0_14 = arith.constant 0 : index
    %c1_15 = arith.constant 1 : index
    %c0_16 = arith.constant 0 : index
    %c0_17 = arith.constant 0 : index
    %11 = vector.load %arg4[%c0_14, %c1_15, %c0_16, %c0_17] : memref<1x3x8x128xf32, #tpu.memory_space<vmem>>, vector<1x1x8x128xf32>
    %12 = vector.shape_cast %11 : vector<1x1x8x128xf32> to vector<8x128xf32>
    %c0_18 = arith.constant 0 : index
    %c2_19 = arith.constant 2 : index
    %c0_20 = arith.constant 0 : index
    %c0_21 = arith.constant 0 : index
    %13 = vector.load %arg4[%c0_18, %c2_19, %c0_20, %c0_21] : memref<1x3x8x128xf32, #tpu.memory_space<vmem>>, vector<1x1x8x128xf32>
    %14 = vector.shape_cast %13 : vector<1x1x8x128xf32> to vector<8x128xf32>
    %c0_22 = arith.constant 0 : index
    %c0_23 = arith.constant 0 : index
    %c0_24 = arith.constant 0 : index
    %c0_25 = arith.constant 0 : index
    %15 = vector.load %arg5[%c0_22, %c0_23, %c0_24, %c0_25] : memref<1x3x8x128xf32, #tpu.memory_space<vmem>>, vector<1x1x8x128xf32>
    %16 = vector.shape_cast %15 : vector<1x1x8x128xf32> to vector<8x128xf32>
    %c0_26 = arith.constant 0 : index
    %c1_27 = arith.constant 1 : index
    %c0_28 = arith.constant 0 : index
    %c0_29 = arith.constant 0 : index
    %17 = vector.load %arg5[%c0_26, %c1_27, %c0_28, %c0_29] : memref<1x3x8x128xf32, #tpu.memory_space<vmem>>, vector<1x1x8x128xf32>
    %18 = vector.shape_cast %17 : vector<1x1x8x128xf32> to vector<8x128xf32>
    %c0_30 = arith.constant 0 : index
    %c2_31 = arith.constant 2 : index
    %c0_32 = arith.constant 0 : index
    %c0_33 = arith.constant 0 : index
    %19 = vector.load %arg5[%c0_30, %c2_31, %c0_32, %c0_33] : memref<1x3x8x128xf32, #tpu.memory_space<vmem>>, vector<1x1x8x128xf32>
    %20 = vector.shape_cast %19 : vector<1x1x8x128xf32> to vector<8x128xf32>
    %21 = arith.mulf %16, %16 : vector<8x128xf32>
    %22 = arith.mulf %18, %18 : vector<8x128xf32>
    %23 = arith.addf %21, %22 : vector<8x128xf32>
    %24 = arith.mulf %20, %20 : vector<8x128xf32>
    %25 = arith.addf %23, %24 : vector<8x128xf32>
    %cst = arith.constant 0.000000e+00 : f32
    %26 = vector.broadcast %cst : f32 to vector<8x128xf32>
    %27 = arith.cmpf one, %25, %26 : vector<8x128xf32>
    %28 = arith.mulf %10, %10 : vector<8x128xf32>
    %29 = arith.mulf %12, %12 : vector<8x128xf32>
    %30 = arith.addf %28, %29 : vector<8x128xf32>
    %31 = arith.mulf %14, %14 : vector<8x128xf32>
    %32 = arith.addf %30, %31 : vector<8x128xf32>
    %cst_34 = arith.constant 0.000000e+00 : f32
    %33 = vector.broadcast %cst_34 : f32 to vector<8x128xf32>
    %34 = arith.cmpf one, %32, %33 : vector<8x128xf32>
    %35 = arith.andi %27, %34 : vector<8x128xi1>
    %36 = arith.mulf %4, %4 : vector<8x128xf32>
    %37 = arith.mulf %6, %6 : vector<8x128xf32>
    %38 = arith.addf %36, %37 : vector<8x128xf32>
    %39 = arith.mulf %8, %8 : vector<8x128xf32>
    %40 = arith.addf %38, %39 : vector<8x128xf32>
    %cst_35 = arith.constant 0.000000e+00 : f32
    %41 = vector.broadcast %cst_35 : f32 to vector<8x128xf32>
    %42 = arith.cmpf one, %40, %41 : vector<8x128xf32>
    %43 = arith.andi %35, %42 : vector<8x128xi1>
    %44 = arith.extui %43 : vector<8x128xi1> to vector<8x128xi32>
    %45 = arith.sitofp %44 : vector<8x128xi32> to vector<8x128xf32>
    %46 = arith.subf %10, %4 : vector<8x128xf32>
    %47 = arith.mulf %46, %16 : vector<8x128xf32>
    %48 = arith.subf %12, %6 : vector<8x128xf32>
    %49 = arith.mulf %48, %18 : vector<8x128xf32>
    %50 = arith.addf %47, %49 : vector<8x128xf32>
    %51 = arith.subf %14, %8 : vector<8x128xf32>
    %52 = arith.mulf %51, %20 : vector<8x128xf32>
    %53 = arith.addf %50, %52 : vector<8x128xf32>
    %54 = arith.mulf %45, %53 : vector<8x128xf32>
    %55 = arith.mulf %54, %53 : vector<8x128xf32>
    %cst_36 = arith.constant 2.500000e-01 : f32
    %56 = vector.broadcast %cst_36 : f32 to vector<8x128xf32>
    %57 = arith.addf %56, %55 : vector<8x128xf32>
    %58 = arith.mulf %57, %57 : vector<8x128xf32>
    %cst_37 = arith.constant 2.500000e-01 : f32
    %59 = vector.broadcast %cst_37 : f32 to vector<8x128xf32>
    %60 = arith.divf %59, %58 : vector<8x128xf32>
    %cst_38 = arith.constant 1.000000e-10 : f32
    %61 = vector.broadcast %cst_38 : f32 to vector<8x128xf32>
    %62 = arith.addf %60, %61 : vector<8x128xf32>
    %63 = arith.mulf %62, %55 : vector<8x128xf32>
    %c0_39 = arith.constant 0 : index
    %c0_40 = arith.constant 0 : index
    %64 = vector.load %arg8[%c0_39, %c0_40] : memref<8x128xf32, #tpu.memory_space<vmem>>, vector<8x128xf32>
    %65 = vector.shape_cast %63 : vector<8x128xf32> to vector<1x8x128xf32>
    %cst_41 = arith.constant dense<0.000000e+00> : vector<8x128xf32>
    %66 = vector.multi_reduction <add>, %65, %cst_41 [0] : vector<1x8x128xf32> to vector<8x128xf32>
    %67 = arith.addf %64, %66 : vector<8x128xf32>
    %c0_42 = arith.constant 0 : index
    %c0_43 = arith.constant 0 : index
    %68 = vector.load %arg8[%c0_42, %c0_43] : memref<8x128xf32, #tpu.memory_space<vmem>>, vector<8x128xf32>
    tpu.vector_store %arg8[%c0_42, %c0_43], %67 {strides = array<i32>} : memref<8x128xf32, #tpu.memory_space<vmem>>, vector<8x128xf32>,
    %c0_44 = arith.constant 0 : index
    %c0_45 = arith.constant 0 : index
    %69 = vector.load %arg9[%c0_44, %c0_45] : memref<8x128xf32, #tpu.memory_space<vmem>>, vector<8x128xf32>
    %70 = vector.shape_cast %45 : vector<8x128xf32> to vector<1x8x128xf32>
    %cst_46 = arith.constant dense<0.000000e+00> : vector<8x128xf32>
    %71 = vector.multi_reduction <add>, %70, %cst_46 [0] : vector<1x8x128xf32> to vector<8x128xf32>
    %72 = arith.addf %69, %71 : vector<8x128xf32>
    %c0_47 = arith.constant 0 : index
    %c0_48 = arith.constant 0 : index
    %73 = vector.load %arg9[%c0_47, %c0_48] : memref<8x128xf32, #tpu.memory_space<vmem>>, vector<8x128xf32>
    tpu.vector_store %arg9[%c0_47, %c0_48], %72 {strides = array<i32>} : memref<8x128xf32, #tpu.memory_space<vmem>>, vector<8x128xf32>,
    %c0_i32_49 = arith.constant 0 : i32
    %74 = arith.cmpi eq, %arg2, %c0_i32_49 : i32
    %75 = arith.extui %74 : i1 to i32
    %c0_i32_50 = arith.constant 0 : i32
    %76 = arith.cmpi ne, %75, %c0_i32_50 : i32
    scf.if %76 {
      %c0_51 = arith.constant 0 : index
      %c0_52 = arith.constant 0 : index
      %77 = vector.load %arg8[%c0_51, %c0_52] : memref<8x128xf32, #tpu.memory_space<vmem>>, vector<8x128xf32>
      %c0_53 = arith.constant 0 : index
      %c0_54 = arith.constant 0 : index
      %c0_55 = arith.constant 0 : index
      %c0_56 = arith.constant 0 : index
      %78 = vector.load %arg6[%c0_53, %c0_54, %c0_55, %c0_56] : memref<1x1x8x128xf32, #tpu.memory_space<vmem>>, vector<1x1x8x128xf32>
      %79 = vector.shape_cast %78 : vector<1x1x8x128xf32> to vector<8x128xf32>
      %80 = vector.shape_cast %77 : vector<8x128xf32> to vector<1x1x8x128xf32>
      tpu.vector_store %arg6[%c0_53, %c0_54, %c0_55, %c0_56], %80 {strides = array<i32>} : memref<1x1x8x128xf32, #tpu.memory_space<vmem>>, vector<1x1x8x128xf32>,
      %c0_57 = arith.constant 0 : index
      %c0_58 = arith.constant 0 : index
      %81 = vector.load %arg9[%c0_57, %c0_58] : memref<8x128xf32, #tpu.memory_space<vmem>>, vector<8x128xf32>
      %c0_59 = arith.constant 0 : index
      %c0_60 = arith.constant 0 : index
      %c0_61 = arith.constant 0 : index
      %c0_62 = arith.constant 0 : index
      %82 = vector.load %arg7[%c0_59, %c0_60, %c0_61, %c0_62] : memref<1x1x8x128xf32, #tpu.memory_space<vmem>>, vector<1x1x8x128xf32>
      %83 = vector.shape_cast %82 : vector<1x1x8x128xf32> to vector<8x128xf32>
      %84 = vector.shape_cast %81 : vector<8x128xf32> to vector<1x1x8x128xf32>
      tpu.vector_store %arg7[%c0_59, %c0_60, %c0_61, %c0_62], %84 {strides = array<i32>} : memref<1x1x8x128xf32, #tpu.memory_space<vmem>>, vector<1x1x8x128xf32>,
    } else {
    }
    return
  }
  func.func @transform_0(%arg0: i32, %arg1: i32, %arg2: i32) -> (i32, i32, i32, i32) {
    %c1_i32 = arith.constant 1 : i32
    %0 = arith.muli %arg1, %c1_i32 : i32
    %1 = arith.addi %0, %arg2 : i32
    %c0_i32 = arith.constant 0 : i32
    %c0_i32_0 = arith.constant 0 : i32
    %c0_i32_1 = arith.constant 0 : i32
    return %arg0, %c0_i32, %1, %c0_i32_0 : i32, i32, i32, i32
  }
  func.func @transform_1(%arg0: i32, %arg1: i32, %arg2: i32) -> (i32, i32, i32, i32) {
    %c1_i32 = arith.constant 1 : i32
    %0 = arith.muli %arg1, %c1_i32 : i32
    %1 = arith.addi %0, %arg2 : i32
    %c0_i32 = arith.constant 0 : i32
    %c0_i32_0 = arith.constant 0 : i32
    %c0_i32_1 = arith.constant 0 : i32
    return %arg0, %c0_i32, %1, %c0_i32_0 : i32, i32, i32, i32
  }
  func.func @transform_2(%arg0: i32, %arg1: i32, %arg2: i32) -> (i32, i32, i32, i32) {
    %c1_i32 = arith.constant 1 : i32
    %0 = arith.muli %arg1, %c1_i32 : i32
    %1 = arith.addi %0, %arg2 : i32
    %c0_i32 = arith.constant 0 : i32
    %c0_i32_0 = arith.constant 0 : i32
    %c0_i32_1 = arith.constant 0 : i32
    return %arg0, %c0_i32, %1, %c0_i32_0 : i32, i32, i32, i32
  }
  func.func @transform_3(%arg0: i32, %arg1: i32, %arg2: i32) -> (i32, i32, i32, i32) {
    %c0_i32 = arith.constant 0 : i32
    %c0_i32_0 = arith.constant 0 : i32
    %c0_i32_1 = arith.constant 0 : i32
    return %arg0, %arg1, %c0_i32, %c0_i32_0 : i32, i32, i32, i32
  }
  func.func @transform_4(%arg0: i32, %arg1: i32, %arg2: i32) -> (i32, i32, i32, i32) {
    %c0_i32 = arith.constant 0 : i32
    %c0_i32_0 = arith.constant 0 : i32
    %c0_i32_1 = arith.constant 0 : i32
    return %arg0, %arg1, %c0_i32, %c0_i32_0 : i32, i32, i32, i32
  }
}

</mosaic_0001>

<bundles_post_ra>
// kernel: point_to_plane_forward.2
= control target key start
LH: loop header
LB: loop body
LE: loop exit
PB: predicated region body
PF: predicated region fallthrough
CT: control target
= control target key end

     0   :  { %s752_s0 = inlined_call_operand.hbm [shape: f32[2,4,4], index: 0, kind: input, shape index: {}]   ;;  %s753_s1 = inlined_call_operand.vmem [shape: f32[2,3,16,128], index: 1, kind: input, shape index: {}, may-alias: {1,2}]   ;;  %s754_s2 = inlined_call_operand.vmem [shape: f32[2,3,16,128], index: 2, kind: output, shape index: {}, may-alias: {1,2}]  }
   0x1   :  { %755 = sst [smem:[#allocation7_spill]] %s752_s0 }
   0x2   :  { %7 = vsyncpa [#allocation3], 0  ;;  %s618_s9 = smov 0   ;;  %s620_s10 = smov 0  }
   0x3   :  { %s622_s11 = smov 0   ;;  %s624_s12 = smov 0  }
   0x4   :  { %s626_s13 = smov 0   ;;  %s628_s14 = smov 0  }
   0x5   :  { %s630_s15 = smov 0  }
   0x6 LB: > { %s427_s16 = sadd.s32 4294967295, %s597_s15   ;;  %s22_s17 = sadd.s32 1, %s589_s13  ;;  %s597_s15 = sphi %s630_s15, %s13_s15   ;;  %s593_s14 = sphi %s628_s14, %s766_s14   ;;  %s589_s13 = sphi %s626_s13, %s765_s13   ;;  %s585_s12 = sphi %s624_s12, %s764_s12   ;;  %s581_s11 = sphi %s622_s11, %s763_s11   ;;  %s577_s10 = sphi %s620_s10, %s762_s10   ;;  %s573_s9 = sphi %s618_s9, %s761_s9  }
   0x7   : > { %p23_p0 = scmp.ge.s32.totalorder %s22_s17, 2  ;;  %s25_s18 = sadd.s32 1, %s593_s14 }
   0x8   : > { %s55_s19 = sadd.s32 1, %s577_s10  ;;  %p62_p1 = scmp.ne.s32.totalorder %s577_s10, %s573_s9 }
   0x9   : > { %s768_s17 = smov (%p23_p0, %s22_s17), 0  ;;  %s770_s18 = smov (!%p23_p0, %s25_s18), %s593_s14 }
   0xa   : > { %s51_s20 = ssub.s32 %s589_s13, %s768_s17  ;;  %p63_p2 = scmp.eq.s32.totalorder %s597_s15, 0 }
   0xb   : > { %p27_p3 = scmp.ge.s32.totalorder %s770_s18, 2  ;;  %p94_p4 = scmp.eq.s32.totalorder %s427_s16, 3 }
   0xc   : > { %p665_p5 = por %p63_p2, %p62_p1  ;;  %p429_p6 = scmp.ge.s32.totalorder %s597_s15, 1 }
   0xd   : > { %s772_s18 = smov (%p27_p3, %s770_s18), 0  ;;  %p672_p7 = por %p94_p4, %p62_p1 }
   0xe   : > { %p107_p8 = scmp.lt.s32.totalorder %s597_s15, 5  ;;  %s50_s23 = ssub.s32 %s593_s14, %s772_s18 }
   0xf   : > { %s52_s24 = sor.u32 %s51_s20, %s50_s23  ;;  %p683_p11 = scmp.eq.s32.totalorder %s427_s16, 0 }
  0x10   : > { %p679_p9 = pnand %p429_p6, %p107_p8  ;;  %p53_p10 = scmp.eq.s32.totalorder %s52_s24, 0 }
  0x11   : > { %s599_s28 = smov [#allocation2]   ;;  %s600_s29 = smov 64  }
  0x12   : > { %p462_p12 = pneg %p679_p9  ;;  %s601_s30 = smov 4  }
  0x13   : > { %s690_s27 = scalar_select %p53_p10, %s577_s10, %s55_s19  }
  0x14   : > { %p463_p13 = pnand %p683_p11, %p462_p12  ;;  %s760_s0 = sld [smem:[#allocation7_spill]] }
  0x15   : > { %p431_p0 = scmp.ge.s32.totalorder %s597_s15, 4 }
  0x17   : > { %127 = sbr.rel (%p431_p0) target bundleno = 37 (0x25), region = 20 }
  0x1a   : > { %465 = dma.hbm_to_smem (!%p463_p13), %s760_s0, 128, %s599_s28, [#allocation3], %s600_s29, %s600_s29, %s601_s30  }
  0x1c   : > { %130 = sbr.rel (!%p665_p5) target bundleno = 37 (0x25), region = 24  ;;  %s132_s5 = sand.u32 (%p665_p5), 1, %s577_s10  }
  0x1d   : > { %s455_s6 = smul.u32 (%p665_p5), 6, %s593_s14 }
  0x1e   : > { %s454_s7 = smul.u32 (%p665_p5), 24, %s132_s5 }
  0x1f   : > { %s136_s8 = sadd.s32 (%p665_p5), %s589_s13, %s455_s6 }
  0x20   : > { %s432_s16 = sshll.u32 (%p665_p5), %s136_s8, 3  ;;  %s134_s24 = scalar_lea.vmem (%p665_p5), [#allocation4], %s454_s7 }
  0x21   : > { %s138_s23 = scalar_lea.vmem %s753_s1, %s432_s16 }
  0x22   : > { %v171_v0 = vld [vmem:[%s138_s23] sm:$0xff]  ;;  %v173_v1 = vld [vmem:[%s138_s23 + $0x10] sm:$0xff] }
  0x23   : > { %v175_v2 = vld [vmem:[%s138_s23 + $0x20] sm:$0xff]  ;;  %172 = vst [vmem:[%s134_s24] sm:$0xff] %v171_v0  ;;  %174 = vst [vmem:[%s134_s24 + $0x8] sm:$0xff] %v173_v1 }
  0x24   : > { %176 = vst [vmem:[%s134_s24 + $0x10] sm:$0xff] %v175_v2 }
  0x25 PF: > { %185 = sbr.rel (%p679_p9) target bundleno = 84 (0x54), region = 62 }
  0x2a   : > { %568 = dma.done.wait (%p683_p11), [#allocation3], 128  }
  0x2b   : > { %570 = vsyncadd (%p683_p11), [#allocation3], 4294967168  ;;  %s192_s21 = sand.u32 1, %s573_s9  }
  0x2c   : > { %s713_s28 = smul.u32 24, %s192_s21 }
  0x2e   : > { %s194_s29 = scalar_lea.vmem [#allocation4], %s713_s28 }
  0x2f   : > { %198 = sfence }
  0x30   : > { %v213_v3 = vld [vmem:[%s194_s29] sm:$0xff]  ;;  %v435_v4 = vld [vmem:[%s194_s29 + $0x8] sm:$0xff]  ;;  %v436_v5 = vld [vmem:[%s194_s29 + $0x10] sm:$0xff]  ;;  %s447_s30 = sshll.u32 %s585_s12, 9  ;;  %v602_v25 = vmov 0.0  }
  0x31   : > { %v218_v6 = vmul.f32 %v213_v3, %v213_v3  ;;  %v219_v7 = vmul.f32 %v435_v4, %v435_v4  ;;  %s228_s25 = sld [smem:[#allocation2 + %s447_s30]]  ;;  %s231_s3 = sadd.s32 1, %s447_s30  ;;  %v221_v9 = vmul.f32 %v436_v5, %v436_v5 }
  0x32   : > { %s232_s4 = sld [smem:[#allocation2 + %s231_s3]]  ;;  %s236_s5 = sadd.s32 2, %s447_s30 }
  0x33   : > { %v220_v8 = vadd.f32 %v219_v7, %v218_v6  ;;  %s237_s26 = sld [smem:[#allocation2 + %s236_s5]]  ;;  %s241_s9 = sadd.s32 3, %s447_s30 }
  0x34   : > { %s717_s6 = sld [smem:[#allocation2 + %s241_s9]]  ;;  %s449_s7 = sadd.s32 128, %s447_s30 }
  0x35   : > { %s249_s8 = sld [smem:[#allocation2 + %s449_s7]]  ;;  %s252_s16 = sadd.s32 1, %s449_s7  ;;  %v222_v10 = vadd.f32 %v221_v9, %v220_v8 }
  0x36   : > { %s253_s19 = sld [smem:[#allocation2 + %s252_s16]]  ;;  %s257_s20 = sadd.s32 2, %s449_s7 }
  0x37   : > { %v229_v11 = vstv %s228_s25  ;;  %s258_s23 = sld [smem:[#allocation2 + %s257_s20]]  ;;  %s262_s24 = sadd.s32 3, %s449_s7  ;;  %vm223_vm0 = vcmp.ne.f32.partialorder %v222_v10, 0.0 }
  0x38   : > { %v230_v12 = vmul.f32 %v229_v11, %v213_v3  ;;  %v233_v13 = vstv %s232_s4  ;;  %s719_s21 = sld [smem:[#allocation2 + %s262_s24]]  ;;  %s451_s29 = sadd.s32 256, %s447_s30  ;;  %v437_v26 = vsel %vm223_vm0, 1.0, %v602_v25 }
  0x39   : > { %v234_v14 = vmul.f32 %v435_v4, %v233_v13  ;;  %v238_v15 = vstv %s237_s26  ;;  %s271_s3 = sld [smem:[#allocation2 + %s451_s29]]  ;;  %s274_s5 = sadd.s32 1, %s451_s29 }
  0x3a   : > { %v239_v16 = vmul.f32 %v436_v5, %v238_v15  ;;  %s275_s9 = sld [smem:[#allocation2 + %s274_s5]]  ;;  %s279_s0 = sadd.s32 2, %s451_s29  ;;  %v243_v19 = vstv %s717_s6 }
  0x3b   : > { %v235_v17 = vadd.f32 %v234_v14, %v230_v12  ;;  %v250_v18 = vstv %s249_s8  ;;  %s280_s25 = sld [smem:[#allocation2 + %s279_s0]]  ;;  %s284_s16 = sadd.s32 3, %s451_s29 }
  0x3c   : > { %v251_v20 = vmul.f32 %v250_v18, %v213_v3  ;;  %v254_v21 = vstv %s253_s19  ;;  %s285_s4 = sld [smem:[#allocation2 + %s284_s16]]  ;;  %s212_s0 = scalar_lea.vmem [#allocation5], %s713_s28 }
  0x3d   : > { %v240_v22 = vadd.f32 %v239_v16, %v235_v17  ;;  %v255_v23 = vmul.f32 %v435_v4, %v254_v21  ;;  %v259_v24 = vstv %s258_s23  ;;  %s457_s30 = smul.u32 (%p672_p7), 6, %s585_s12 }
  0x3e   : > { %v260_v27 = vmul.f32 %v436_v5, %v259_v24  ;;  %v264_v31 = vstv %s719_s21 }
  0x3f   : > { %v244_v28 = vadd.f32 %v243_v19, %v240_v22  ;;  %v256_v29 = vadd.f32 %v255_v23, %v251_v20  ;;  %v272_v30 = vstv %s271_s3  ;;  %s299_s26 = sadd.s32 (%p672_p7), %s581_s11, %s457_s30 }
  0x40   : > { %v273_v32 = vmul.f32 %v272_v30, %v213_v3  ;;  %v276_v33 = vstv %s275_s9  ;;  %s444_s28 = sshll.u32 (%p672_p7), %s299_s26, 3 }
  0x41   : > { %v245_v34 = vmul.f32 %v437_v26, %v244_v28  ;;  %v261_v35 = vadd.f32 %v260_v27, %v256_v29  ;;  %v277_v36 = vmul.f32 %v435_v4, %v276_v33  ;;  %v281_v37 = vstv %s280_s25  ;;  %s301_s8 = scalar_lea.vmem (%p672_p7), %s754_s2, %s444_s28 }
  0x42   : > { %v282_v38 = vmul.f32 %v436_v5, %v281_v37  ;;  %v286_v41 = vstv %s285_s4 }
  0x43   : > { %246 = vst [vmem:[%s212_s0] sm:$0xff] %v245_v34  ;;  %v265_v39 = vadd.f32 %v264_v31, %v261_v35  ;;  %v278_v40 = vadd.f32 %v277_v36, %v273_v32 }
  0x45   : > { %v266_v42 = vmul.f32 %v437_v26, %v265_v39  ;;  %v283_v43 = vadd.f32 %v282_v38, %v278_v40 }
  0x47   : > { %441 = vst [vmem:[%s212_s0 + $0x8] sm:$0xff] %v266_v42  ;;  %v287_v44 = vadd.f32 %v286_v41, %v283_v43  ;;  %297 = sbr.rel (!%p672_p7) target bundleno = 84 (0x54), region = 74 }
  0x49   : > { %v288_v45 = vmul.f32 %v437_v26, %v287_v44 }
  0x4a   : > { %v334_v46 = vld [vmem:[%s212_s0] sm:$0xff] (%p672_p7) }
  0x4b   : > { %443 = vst [vmem:[%s212_s0 + $0x10] sm:$0xff] %v288_v45  ;;  %335 = vst [vmem:[%s301_s8] sm:$0xff] (%p672_p7), %v334_v46 }
  0x4e   : > { %v336_v47 = vld [vmem:[%s212_s0 + $0x8] sm:$0xff] }
  0x4f   : > { %337 = vst [vmem:[%s301_s8 + $0x10] sm:$0xff] %v336_v47 }
  0x52   : > { %v338_v48 = vld [vmem:[%s212_s0 + $0x10] sm:$0xff] }
  0x53   : > { %339 = vst [vmem:[%s301_s8 + $0x20] sm:$0xff] %v338_v48 }
  0x54 PF: > { %s13_s15 = sadd.s32 1, %s597_s15   ;;  %s761_s9 = smov %s577_s10 }
  0x55   : > { %p10_p1 = scmp.ge.s32.totalorder %s13_s15, 6   ;;  %s762_s10 = smov %s690_s27 }
  0x56   : > { %s763_s11 = smov %s589_s13  ;;  %s764_s12 = smov %s593_s14 }
  0x57   : > { %s765_s13 = smov %s768_s17  ;;  %s766_s14 = smov %s772_s18 }
  0x58   :  { %12 = sbr.rel (!%p10_p1) target bundleno = 6 (0x6), region = 148 }
  0x5d   :  { %355 = vsyncpa [#allocation3], 1 }
  0x5e   :  { %357 = vsyncpa [#allocation3 + $0x1], 1 }

// kernel: point_to_plane_forward.3
= control target key start
LH: loop header
LB: loop body
LE: loop exit
PB: predicated region body
PF: predicated region fallthrough
CT: control target
= control target key end

     0   :  { %s863_s15 = smov 0   ;;  %s865_s16 = smov 0   ;;  %s982_s0 = inlined_call_operand.vmem [shape: f32[2,3,16,128], index: 0, kind: input, shape index: {}]   ;;  %s983_s1 = inlined_call_operand.vmem [shape: f32[2,3,16,128], index: 1, kind: input, shape index: {}]   ;;  %s984_s2 = inlined_call_operand.vmem [shape: f32[2,3,16,128], index: 2, kind: input, shape index: {}]   ;;  %s985_s3 = inlined_call_operand.vmem [shape: f32[2,2,8,128], index: 3, kind: output, shape index: {0}]   ;;  %s986_s4 = inlined_call_operand.vmem [shape: f32[2,2,8,128], index: 4, kind: output, shape index: {1}]  }
   0x1   :  { %s867_s17 = smov 0   ;;  %s869_s18 = smov 0  }
   0x2   :  { %s871_s19 = smov 0   ;;  %s873_s20 = smov 0  }
   0x3   :  { %s875_s21 = smov 0  }
   0x4 LB: > { %s30_s22 = sadd.s32 1, %s827_s19  ;;  %s34_s23 = sadd.s32 1, %s831_s20  ;;  %s835_s21 = sphi %s875_s21, %s15_s21   ;;  %s831_s20 = sphi %s873_s20, %s993_s20   ;;  %s827_s19 = sphi %s871_s19, %s992_s19   ;;  %s823_s18 = sphi %s869_s18, %s991_s18   ;;  %s819_s17 = sphi %s867_s17, %s990_s17   ;;  %s815_s16 = sphi %s865_s16, %s989_s16   ;;  %s811_s15 = sphi %s863_s15, %s988_s15  }
   0x5   : > { %p32_p0 = scmp.ge.s32.totalorder %s30_s22, 2  ;;  %p52_p1 = scmp.ne.s32.totalorder %s815_s16, %s811_s15 }
   0x6   : > { %p53_p2 = scmp.eq.s32.totalorder %s835_s21, 0  ;;  %s45_s28 = sadd.s32 1, %s815_s16 }
   0x7   : > { %s995_s22 = smov (%p32_p0, %s30_s22), 0  ;;  %s997_s23 = smov (!%p32_p0, %s34_s23), %s831_s20 }
   0x8   : > { %p906_p3 = por %p53_p2, %p52_p1  ;;  %p36_p4 = scmp.ge.s32.totalorder %s997_s23, 2 }
   0x9   : > { %s41_s25 = ssub.s32 %s827_s19, %s995_s22  ;;  %p697_p6 = scmp.ge.s32.totalorder %s835_s21, 4 }
   0xa   : > { %s999_s23 = smov (%p36_p4, %s997_s23), 0 }
   0xb   : > { %s40_s26 = ssub.s32 %s831_s20, %s999_s23  ;;  %194 = sbr.rel (%p697_p6) target bundleno = 43 (0x2b), region = 16 }
   0xc   : > { %s42_s27 = sor.u32 %s41_s25, %s40_s26 }
   0xd   : > { %p43_p5 = scmp.eq.s32.totalorder %s42_s27, 0 }
   0xf   : > { %s918_s29 = scalar_select %p43_p5, %s815_s16, %s45_s28  }
  0x10   : > { %197 = sbr.rel (!%p906_p3) target bundleno = 25 (0x19), region = 20  ;;  %s199_s30 = sand.u32 (%p906_p3), 1, %s815_s16  }
  0x11   : > { %s716_s5 = smul.u32 (%p906_p3), 6, %s831_s20 }
  0x12   : > { %s715_s6 = smul.u32 (%p906_p3), 24, %s199_s30 }
  0x13   : > { %s204_s7 = sadd.s32 (%p906_p3), %s827_s19, %s716_s5 }
  0x14   : > { %s698_s8 = sshll.u32 (%p906_p3), %s204_s7, 3  ;;  %s201_s12 = scalar_lea.vmem (%p906_p3), [#allocation4], %s715_s6 }
  0x15   : > { %s206_s11 = scalar_lea.vmem %s982_s0, %s698_s8 }
  0x16   : > { %v239_v0 = vld [vmem:[%s206_s11] sm:$0xff]  ;;  %v241_v1 = vld [vmem:[%s206_s11 + $0x10] sm:$0xff] }
  0x17   : > { %v243_v2 = vld [vmem:[%s206_s11 + $0x20] sm:$0xff]  ;;  %240 = vst [vmem:[%s201_s12] sm:$0xff] %v239_v0  ;;  %242 = vst [vmem:[%s201_s12 + $0x8] sm:$0xff] %v241_v1 }
  0x18   : > { %244 = vst [vmem:[%s201_s12 + $0x10] sm:$0xff] %v243_v2 }
  0x19 PF: > { %250 = sbr.rel (!%p906_p3) target bundleno = 34 (0x22), region = 58  ;;  %s252_s13 = sand.u32 (%p906_p3), 1, %s815_s16  }
  0x1a   : > { %s718_s14 = smul.u32 (%p906_p3), 6, %s831_s20 }
  0x1b   : > { %s717_s25 = smul.u32 (%p906_p3), 24, %s252_s13 }
  0x1c   : > { %s257_s26 = sadd.s32 (%p906_p3), %s827_s19, %s718_s14 }
  0x1d   : > { %s699_s27 = sshll.u32 (%p906_p3), %s257_s26, 3  ;;  %s254_s6 = scalar_lea.vmem (%p906_p3), [#allocation5], %s717_s25 }
  0x1e   : > { %s259_s5 = scalar_lea.vmem %s983_s1, %s699_s27 }
  0x1f   : > { %v292_v3 = vld [vmem:[%s259_s5] sm:$0xff]  ;;  %v294_v4 = vld [vmem:[%s259_s5 + $0x10] sm:$0xff] }
  0x20   : > { %v296_v5 = vld [vmem:[%s259_s5 + $0x20] sm:$0xff]  ;;  %293 = vst [vmem:[%s254_s6] sm:$0xff] %v292_v3  ;;  %295 = vst [vmem:[%s254_s6 + $0x8] sm:$0xff] %v294_v4 }
  0x21   : > { %297 = vst [vmem:[%s254_s6 + $0x10] sm:$0xff] %v296_v5 }
  0x22 PF: > { %303 = sbr.rel (!%p906_p3) target bundleno = 43 (0x2b), region = 96  ;;  %s305_s7 = sand.u32 (%p906_p3), 1, %s815_s16  }
  0x23   : > { %s720_s8 = smul.u32 (%p906_p3), 6, %s831_s20 }
  0x24   : > { %s719_s9 = smul.u32 (%p906_p3), 24, %s305_s7 }
  0x25   : > { %s310_s10 = sadd.s32 (%p906_p3), %s827_s19, %s720_s8 }
  0x26   : > { %s700_s11 = sshll.u32 (%p906_p3), %s310_s10, 3  ;;  %s307_s25 = scalar_lea.vmem (%p906_p3), [#allocation6], %s719_s9 }
  0x27   : > { %s312_s14 = scalar_lea.vmem %s984_s2, %s700_s11 }
  0x28   : > { %v345_v6 = vld [vmem:[%s312_s14] sm:$0xff]  ;;  %v347_v7 = vld [vmem:[%s312_s14 + $0x10] sm:$0xff] }
  0x29   : > { %v349_v8 = vld [vmem:[%s312_s14 + $0x20] sm:$0xff]  ;;  %346 = vst [vmem:[%s307_s25] sm:$0xff] %v345_v6  ;;  %348 = vst [vmem:[%s307_s25 + $0x8] sm:$0xff] %v347_v7 }
  0x2a   : > { %350 = vst [vmem:[%s307_s25 + $0x10] sm:$0xff] %v349_v8 }
  0x2b PF: > { %p701_p7 = scmp.ge.s32.totalorder %s835_s21, 1  ;;  %p355_p8 = scmp.lt.s32.totalorder %s835_s21, 5 }
  0x2d   : > { %p356_p9 = pnand %p701_p7, %p355_p8 }
  0x2e   : > { %s362_s24 = sand.u32 (!%p356_p9), 1, %s811_s15   ;;  %p423_p10 = scmp.lt.s32.totalorder (!%p356_p9), %s823_s18, 1 }
  0x2f   : > { %359 = sbr.rel (%p356_p9) target bundleno = 94 (0x5e), region = 134  ;;  %p425_p11 = scmp.lt.s32.totalorder (!%p356_p9), %s819_s17, 1 }
  0x30   : > { %s721_s26 = smul.u32 (!%p356_p9), 24, %s362_s24 }
  0x32   : > { %s364_s28 = scalar_lea.vmem (!%p356_p9), [#allocation4], %s721_s26  ;;  %s371_s30 = scalar_lea.vmem (!%p356_p9), [#allocation5], %s721_s26 }
  0x33   : > { %s378_s5 = scalar_lea.vmem (!%p356_p9), [#allocation6], %s721_s26 }
  0x34   : > { %s1001_s18 = smov (!%p423_p10, %s823_s18), 1  ;;  %v445_v9 = vld [vmem:[%s364_s28] sm:$0xff]  ;;  %v706_v10 = vld [vmem:[%s364_s28 + $0x8] sm:$0xff]  ;;  %v707_v11 = vld [vmem:[%s364_s28 + $0x10] sm:$0xff]  ;;  %s1003_s17 = smov (!%p425_p11, %s819_s17), 1  ;;  %v837_v41 = vmov 0.0  }
  0x35   : > { %s702_s27 = sshll.u32 %s1001_s18, 1  ;;  %v450_v12 = vld [vmem:[%s371_s30] sm:$0xff]  ;;  %v708_v13 = vld [vmem:[%s371_s30 + $0x8] sm:$0xff]  ;;  %v709_v14 = vld [vmem:[%s371_s30 + $0x10] sm:$0xff]  ;;  %v473_v15 = vmul.f32 %v445_v9, %v445_v9  ;;  %v474_v16 = vmul.f32 %v706_v10, %v706_v10  ;;  %v476_v17 = vmul.f32 %v707_v11, %v707_v11 }
  0x36   : > { %v455_v18 = vld [vmem:[%s378_s5] sm:$0xff]  ;;  %v710_v19 = vld [vmem:[%s378_s5 + $0x8] sm:$0xff]  ;;  %v711_v20 = vld [vmem:[%s378_s5 + $0x10] sm:$0xff]  ;;  %v466_v21 = vmul.f32 %v450_v12, %v450_v12  ;;  %v467_v22 = vmul.f32 %v708_v13, %v708_v13  ;;  %v469_v23 = vmul.f32 %v709_v14, %v709_v14  ;;  %v482_v24 = vsub.f32 %v450_v12, %v445_v9  ;;  %s952_s15 = sadd.s32 %s702_s27, %s1003_s17 }
  0x37   : > { %v460_v25 = vmul.f32 %v455_v18, %v455_v18  ;;  %v461_v26 = vmul.f32 %v710_v19, %v710_v19  ;;  %v463_v27 = vmul.f32 %v711_v20, %v711_v20  ;;  %v475_v28 = vadd.f32 %v474_v16, %v473_v15  ;;  %s703_s18 = sshll.u32 %s952_s15, 3 }
  0x38   : > { %v468_v29 = vadd.f32 %v467_v22, %v466_v21  ;;  %v483_v30 = vmul.f32 %v482_v24, %v455_v18  ;;  %v484_v31 = vsub.f32 %v708_v13, %v706_v10  ;;  %v487_v32 = vsub.f32 %v709_v14, %v707_v11  ;;  %s438_s7 = scalar_lea.vmem %s986_s4, %s703_s18  ;;  %s430_s10 = scalar_lea.vmem %s985_s3, %s703_s18 }
  0x39   : > { %v462_v33 = vadd.f32 %v461_v26, %v460_v25  ;;  %v477_v34 = vadd.f32 %v476_v17, %v475_v28 }
  0x3a   : > { %v470_v35 = vadd.f32 %v469_v23, %v468_v29  ;;  %v485_v36 = vmul.f32 %v710_v19, %v484_v31  ;;  %v488_v37 = vmul.f32 %v711_v20, %v487_v32 }
  0x3b   : > { %v464_v38 = vadd.f32 %v463_v27, %v462_v33  ;;  %vm478_vm1 = vcmp.ne.f32.partialorder %v477_v34, 0.0 }
  0x3c   : > { %vm471_vm0 = vcmp.ne.f32.partialorder %v470_v35, 0.0  ;;  %v486_v39 = vadd.f32 %v485_v36, %v483_v30 }
  0x3d   : > { %vm465_vm2 = vcmp.ne.f32.partialorder %v464_v38, 0.0 }
  0x3e   : > { %vm472_vm3 = vmand %vm465_vm2, %vm471_vm0  ;;  %v489_v40 = vadd.f32 %v488_v37, %v486_v39 }
  0x3f   : > { %vm479_vm4 = vmand %vm472_vm3, %vm478_vm1 }
  0x40   : > { %v712_v42 = vsel %vm479_vm4, 1.0, %v837_v41 }
  0x41   : > { %v490_v43 = vmul.f32 %v712_v42, %v489_v40  ;;  %512 = vst [vmem:[%s438_s7] sm:$0xff] %v712_v42 }
  0x43   : > { %v491_v44 = vmul.f32 %v490_v43, %v489_v40 }
  0x45   : > { %v492_v45 = vadd.f32 0.25, %v491_v44 }
  0x47   : > { %v493_v46 = vmul.f32 %v492_v45, %v492_v45 }
  0x49   : > { %779 = vrcp.f32 %v493_v46 }
  0x56   : > { %v780_v47 = vpop.eup %779 }
  0x57   : > { %v495_v48 = vmul.f32 0.25, %v780_v47 }
  0x59   : > { %v496_v49 = vadd.f32 1e-10, %v495_v48 }
  0x5b   : > { %v497_v50 = vmul.f32 %v496_v49, %v491_v44 }
  0x5d   : > { %510 = vst [vmem:[%s430_s10] sm:$0xff] %v497_v50 }
  0x5e PF: > { %s15_s21 = sadd.s32 1, %s835_s21   ;;  %s988_s15 = smov %s815_s16 }
  0x5f   : > { %p12_p12 = scmp.ge.s32.totalorder %s15_s21, 6   ;;  %s989_s16 = smov %s918_s29 }
  0x60   : > { %s990_s17 = smov %s827_s19  ;;  %s991_s18 = smov %s831_s20 }
  0x61   : > { %s992_s19 = smov %s995_s22  ;;  %s993_s20 = smov %s999_s23 }
  0x62   :  { %14 = sbr.rel (!%p12_p12) target bundleno = 4 (0x4), region = 223 }

</bundles_post_ra>
